<compile_context>
chip_gen: v7x
topology: tpu7x:2x2x1
jax: 0.10.0
libtpu: 0.0.40
codegen_flags: <defaults>
</compile_context>

<pallas_src>
from functools import partial

import jax
import jax.numpy as jnp
from jax.experimental import pallas as pl
from jax.experimental.pallas import tpu as pltpu

GAIN_DB = 6.0
GAIN_FACTOR = float(10.0 ** (GAIN_DB / 20.0))  # deterministic "transform" parameter
P_APPLY = 0.5

_LANES_CANDIDATES = (1024, 512, 256, 128)  # lane-dense last dim, multiple of 128


def _gain_kernel(x_ref, o_ref):
    # Pure elementwise transform; the apply/passthrough decision is made
    # outside the kernel (lax.cond), so no flag / select is needed here.
    # Note: multiply happens in o_ref.dtype (bf16 inputs round in bf16).
    o_ref[...] = x_ref[...] * jnp.asarray(GAIN_FACTOR, dtype=o_ref.dtype)


def _row_tile_cap():
    """Generation-aware max rows per block (trace-time, shape-static)."""
    try:
        kind = jax.devices()[0].device_kind.lower()
    except Exception:
        return 512
    if ("v6" in kind) or ("v7" in kind) or ("7x" in kind):
        return 1024  # 4 MiB f32 blocks; 16 MiB double-buffered in+out
    return 512       # v5e: stay well inside the 16 MiB scoped-VMEM default


def _choose_lanes(n):
    """Largest lane-dense width in {1024,512,256,128} dividing n (n % 128 == 0)."""
    for cand in _LANES_CANDIDATES:
        if n % cand == 0:
            return cand
    return 128  # unreachable when n % 128 == 0


def _gain_pallas(x2d):
    """Lane-dense, big-block streaming multiply on an (m, lanes) slab."""
    m, lanes = x2d.shape
    itemsize = jnp.dtype(x2d.dtype).itemsize
    row_cap = _row_tile_cap()

    if m <= 8:
        row_tile = m  # full-extent block (allowed even if not 8-divisible)
    else:
        # >= 2 balanced grid steps so "parallel" can feed both TCs on v7x,
        # while keeping each block under the generation's row cap.
        nsteps = max(2, pl.cdiv(m, row_cap))
        rows_per_step = pl.cdiv(m, nsteps)
        row_tile = min(((rows_per_step + 7) // 8) * 8, row_cap)

    grid = (pl.cdiv(m, row_tile),)
    block_bytes = row_tile * lanes * itemsize
    # in + out, double-buffered, plus headroom.
    vmem_limit = int(max(4 * block_bytes + (2 << 20), 8 << 20))

    total = m * lanes
    cost = pl.CostEstimate(
        flops=total, transcendentals=0, bytes_accessed=2 * total * itemsize
    )

    return pl.pallas_call(
        _gain_kernel,
        out_shape=jax.ShapeDtypeStruct((m, lanes), x2d.dtype),
        grid_spec=pltpu.PrefetchScalarGridSpec(
            num_scalar_prefetch=0,
            grid=grid,
            in_specs=[pl.BlockSpec((row_tile, lanes), lambda i: (i, 0))],
            out_specs=pl.BlockSpec((row_tile, lanes), lambda i: (i, 0)),
        ),
        input_output_aliases={0: 0},  # donate the input slab (pure elementwise)
        cost_estimate=cost,
        compiler_params=pltpu.CompilerParams(
            dimension_semantics=("parallel",),
            vmem_limit_bytes=vmem_limit,
        ),
    )(x2d)


def _apply_gain(img):
    """transform(img): elementwise gain. Pad-free bulk kernel + tiny jnp tail."""
    orig_shape, dtype = img.shape, img.dtype
    total = img.size
    g = jnp.asarray(GAIN_FACTOR, dtype=dtype)
    flat = img.reshape(-1)

    bulk = (total // 128) * 128
    if bulk == 0:
        # Degenerate tiny input: not worth a kernel launch.
        return (flat * g).reshape(orig_shape)

    lanes = _choose_lanes(bulk)
    out2d = _gain_pallas(flat[:bulk].reshape(bulk // lanes, lanes))
    out_flat = out2d.reshape(-1)

    if bulk != total:
        # Rare ragged tail (< 128 elements): plain VPU multiply on the slice.
        out_flat = jnp.concatenate([out_flat, flat[bulk:] * g])
    return out_flat.reshape(orig_shape)


@partial(jax.jit, static_argnames=("p",))
def random_apply(img, key, p=P_APPLY):
    """img: (N, C, H, W). Returns transform(img) iff u <= p, else img unchanged."""
    u = jax.random.uniform(key, (), dtype=jnp.float32)
    # Short-circuit: the passthrough branch never touches a kernel.
    return jax.lax.cond(u <= p, _apply_gain, lambda x: x, img)


if __name__ == "__main__":
    key = jax.random.PRNGKey(0)
    k_data, k_apply = jax.random.split(key)

    # Small NCHW input consistent with the module's `img` argument.
    x = jax.random.normal(k_data, (2, 4, 16, 16), dtype=jnp.float32)
    out = jax.block_until_ready(random_apply(x, k_apply, p=P_APPLY))

    # Reference check (pure JAX) of the RandomApply semantics.
    u = jax.random.uniform(k_apply, (), dtype=jnp.float32)
    ref = jnp.where(u <= P_APPLY, x * GAIN_FACTOR, x)
    assert out.shape == x.shape and out.dtype == x.dtype
    assert jnp.allclose(out, ref, atol=1e-6), "mismatch vs reference (p=0.5 branch)"

    # Ragged-path check (total=1155: 128-wide lanes, ragged last grid block,
    # <128-element tail handled outside the kernel). p=1.0 forces apply.
    x2 = jax.random.normal(k_data, (3, 5, 7, 11), dtype=jnp.float32)
    out2 = jax.block_until_ready(random_apply(x2, k_apply, p=1.0))
    assert out2.shape == x2.shape and out2.dtype == x2.dtype
    assert jnp.allclose(out2, x2 * GAIN_FACTOR, atol=1e-6), "mismatch on ragged path"

    print("KERNEL_OK")
</pallas_src>

<mosaic_0001>
module attributes {stable_mosaic.version = 11 : i64} {
  func.func @_gain_kernel(%arg0: i32, %arg1: memref<2x1024xf32, #tpu.memory_space<vmem>>, %arg2: memref<2x1024xf32, #tpu.memory_space<vmem>>) attributes {dimension_semantics = [#tpu.dimension_semantics<parallel>], iteration_bounds = array<i64: 1>, scalar_prefetch = 0 : i64, scratch_operands = 0 : i64, tpu.core_type = #tpu.core_type<tc>, window_params = [{transform_indices = @transform_0, window_bounds = array<i64: 2, 1024>}, {transform_indices = @transform_1, window_bounds = array<i64: 2, 1024>}]} {
    %c0 = arith.constant 0 : index
    %c0_0 = arith.constant 0 : index
    %0 = vector.load %arg1[%c0, %c0_0] : memref<2x1024xf32, #tpu.memory_space<vmem>>, vector<2x1024xf32>
    %cst = arith.constant 1.99526227 : f32
    %1 = vector.broadcast %cst : f32 to vector<2x1024xf32>
    %2 = arith.mulf %0, %1 : vector<2x1024xf32>
    %c0_1 = arith.constant 0 : index
    %c0_2 = arith.constant 0 : index
    %3 = vector.load %arg2[%c0_1, %c0_2] : memref<2x1024xf32, #tpu.memory_space<vmem>>, vector<2x1024xf32>
    tpu.vector_store %arg2[%c0_1, %c0_2], %2 {strides = array<i32>} : memref<2x1024xf32, #tpu.memory_space<vmem>>, vector<2x1024xf32>,
    return
  }
  func.func @transform_0(%arg0: i32) -> (i32, i32) {
    %c0_i32 = arith.constant 0 : i32
    %c0_i32_0 = arith.constant 0 : i32
    return %arg0, %c0_i32 : i32, i32
  }
  func.func @transform_1(%arg0: i32) -> (i32, i32) {
    %c0_i32 = arith.constant 0 : i32
    %c0_i32_0 = arith.constant 0 : i32
    return %arg0, %c0_i32 : i32, i32
  }
}

</mosaic_0001>

<bundles_post_ra>
// kernel: branch_1_fun.1
= control target key start
LH: loop header
LB: loop body
LE: loop exit
PB: predicated region body
PF: predicated region fallthrough
CT: control target
= control target key end

     0   :  { %s40_s0 = inlined_call_operand.vmem [shape: f32[2,1024], index: 0, kind: input, shape index: {}, may-alias: {0,1}]   ;;  %s41_s1 = inlined_call_operand.vmem [shape: f32[2,1024], index: 1, kind: output, shape index: {}, may-alias: {0,1}]  }
   0x1   :  { %v8_v0 = vld [vmem:[%s40_s0] sm:$0xff]  ;;  %v9_v1 = vld [vmem:[%s40_s0 + $0x8] sm:$0xff] }
   0x2   :  { %v10_v2 = vmul.f32 1.9952623, %v8_v0  ;;  %v11_v3 = vmul.f32 1.9952623, %v9_v1 }
   0x4   :  { %12 = vst [vmem:[%s41_s1] sm:$0xff] %v10_v2  ;;  %13 = vst [vmem:[%s41_s1 + $0x8] sm:$0xff] %v11_v3 }

</bundles_post_ra>
